<compile_context>
chip_gen: v6e
topology: v6e:2x2x1
jax: 0.10.0
libtpu: 0.0.40
codegen_flags: <defaults>
</compile_context>

<pallas_src>
import jax
import jax.numpy as jnp
from jax.experimental import pallas as pl
from jax.experimental.pallas import tpu as pltpu


def _make_kernel(seq_len: int, emb_dim: int):
    """Kernel processing TB batch elements per grid step."""
    L, E = seq_len, emb_dim

    def kernel(x_ref, w_ref, bconv_ref, wfc_ref, bfc_ref, out_ref):
        # x_ref    : (TB, L, E)  embedded sequences (f32)
        # w_ref    : (3E, 64)    im2col conv weight, rows = [tap0; tap1; tap2]
        # bconv_ref: (1, 64)     conv bias (f32)
        # wfc_ref  : (64, Cp)    fc weight (transposed, lane-padded)
        # bfc_ref  : (1, Cp)     fc bias (f32, lane-padded)
        # out_ref  : (TB, Cp)    logits tile (f32)
        x = x_ref[...]                                     # (TB, L, E)
        tb = x.shape[0]

        # Conv halo (padding=1) built in-kernel: zero boundary rows.
        zero_row = jnp.zeros((tb, 1, E), x.dtype)
        x_prev = jnp.concatenate([zero_row, x[:, : L - 1, :]], axis=1)
        x_next = jnp.concatenate([x[:, 1:, :], zero_row], axis=1)

        # im2col: (TB, L, 3E) -> fold batch into M -> single MXU matmul.
        cols = jnp.concatenate([x_prev, x, x_next], axis=-1)
        cols = cols.reshape(tb * L, 3 * E)

        acc = jnp.dot(
            cols.astype(w_ref.dtype),                      # bf16 path on v6e/v7x
            w_ref[...],
            preferred_element_type=jnp.float32,
        )                                                  # (TB*L, 64) f32
        acc = jnp.maximum(acc + bconv_ref[...], 0.0)       # bias + ReLU (f32 VPU)

        # AdaptiveAvgPool1d(1): sum over L, scale by constant 1/L.
        pooled = jnp.sum(acc.reshape(tb, L, 64), axis=1) * (1.0 / L)   # (TB, 64)

        # Linear(64 -> Cp) -- lane-dense output tile.
        logits = (
            jnp.dot(
                pooled.astype(wfc_ref.dtype),
                wfc_ref[...],
                preferred_element_type=jnp.float32,
            )
            + bfc_ref[...]
        )                                                  # (TB, Cp)
        out_ref[...] = logits.astype(out_ref.dtype)

    return kernel


def emotion_classifier_forward(
    token_ids, emb_table, conv_w, conv_b, fc_w, fc_b,
    *, batch_tile: int = 256, matmul_dtype=jnp.float32,
):
    """Forward pass matching the PyTorch EmotionClassifier.

    token_ids : (B, L) int32
    emb_table : (vocab, E) f32       (row pad_idx is zero)
    conv_w    : (64, E, 3) f32       (PyTorch Conv1d weight layout)
    conv_b    : (64,)      f32
    fc_w      : (C, 64)    f32       (PyTorch Linear weight layout)
    fc_b      : (C,)       f32
    returns   : (B, C)     f32 logits
    """
    B, L = token_ids.shape
    E = emb_table.shape[1]
    C_out = conv_w.shape[0]          # 64 conv channels
    C = fc_w.shape[0]                # num classes

    # Embedding gather stays as a single XLA gather; halo pad is now in-kernel.
    # TODO(synk): fuse the embedding row-gather itself into the kernel
    # (scalar-prefetched token_ids + VMEM-resident table / DMA gather).
    x = emb_table[token_ids].astype(jnp.float32)           # (B, L, E)

    # im2col conv weight: (64, E, 3) -> (3, E, 64) -> (3E, 64), tap-major rows.
    w_im2col = (
        jnp.transpose(conv_w, (2, 1, 0)).reshape(3 * E, C_out).astype(matmul_dtype)
    )
    bconv = conv_b.reshape(1, C_out).astype(jnp.float32)

    # Lane-dense FC output: pad num_classes up to a multiple of 128 lanes.
    Cp = max(128, ((C + 127) // 128) * 128)
    wfc = jnp.zeros((C_out, Cp), matmul_dtype).at[:, :C].set(
        fc_w.T.astype(matmul_dtype)
    )
    bfc = jnp.zeros((1, Cp), jnp.float32).at[:, :C].set(fc_b.astype(jnp.float32))

    # Batch tiling: fold TB sequences into the matmul M dimension.
    # Cap TB so the (double-buffered) x tile stays well inside scoped VMEM
    # (relevant on v7x's 64 MiB / 32 MiB-scoped at production E, L).
    vmem_cap = max(8, (4 * 1024 * 1024) // max(1, L * E * 4))
    tb_cap = max(8, (min(batch_tile, vmem_cap) // 8) * 8)
    if B <= tb_cap:
        TB, Bp = B, B
    else:
        TB = tb_cap
        Bp = pl.cdiv(B, TB) * TB
        x = jnp.pad(x, ((0, Bp - B), (0, 0), (0, 0)))

    out = pl.pallas_call(
        _make_kernel(L, E),
        out_shape=jax.ShapeDtypeStruct((Bp, Cp), jnp.float32),
        grid_spec=pltpu.PrefetchScalarGridSpec(
            num_scalar_prefetch=0,
            grid=(Bp // TB,),
            in_specs=[
                pl.BlockSpec((TB, L, E), lambda b: (b, 0, 0)),
                pl.BlockSpec((3 * E, C_out), lambda b: (0, 0)),
                pl.BlockSpec((1, C_out), lambda b: (0, 0)),
                pl.BlockSpec((C_out, Cp), lambda b: (0, 0)),
                pl.BlockSpec((1, Cp), lambda b: (0, 0)),
            ],
            out_specs=pl.BlockSpec((TB, Cp), lambda b: (b, 0)),
        ),
        compiler_params=pltpu.CompilerParams(
            dimension_semantics=("parallel",),   # feeds both TCs on v7x
        ),
    )(x, w_im2col, bconv, wfc, bfc)

    return out[:B, :C]


def _reference_forward(token_ids, emb_table, conv_w, conv_b, fc_w, fc_b):
    """Pure-JAX reference mirroring the PyTorch ops exactly."""
    x = emb_table[token_ids]                          # (B, L, E)
    x = jnp.transpose(x, (0, 2, 1))                   # (B, E, L)  (permute(0,2,1))
    y = jax.lax.conv_general_dilated(
        x, conv_w, window_strides=(1,), padding=((1, 1),),
        dimension_numbers=("NCH", "OIH", "NCH"),
    ) + conv_b[None, :, None]                         # (B, 64, L)
    y = jnp.maximum(y, 0.0)
    y = jnp.mean(y, axis=2)                           # (B, 64)
    return y @ fc_w.T + fc_b                          # (B, C)


if __name__ == "__main__":
    # Small synthetic shapes consistent with the module's forward.
    B, L = 2, 8
    VOCAB, E, C = 32, 32, 6
    PAD_IDX = 0

    key = jax.random.PRNGKey(0)
    k_emb, k_cw, k_cb, k_fw, k_fb, k_tok = jax.random.split(key, 6)

    emb_table = 0.1 * jax.random.normal(k_emb, (VOCAB, E), jnp.float32)
    emb_table = emb_table.at[PAD_IDX].set(0.0)        # nn.Embedding padding_idx
    conv_w = 0.1 * jax.random.normal(k_cw, (64, E, 3), jnp.float32)
    conv_b = 0.1 * jax.random.normal(k_cb, (64,), jnp.float32)
    fc_w = 0.1 * jax.random.normal(k_fw, (C, 64), jnp.float32)
    fc_b = 0.1 * jax.random.normal(k_fb, (C,), jnp.float32)

    token_ids = jax.random.randint(k_tok, (B, L), 0, VOCAB, jnp.int32)

    ref = _reference_forward(token_ids, emb_table, conv_w, conv_b, fc_w, fc_b)

    # f32 MXU path: must match the f32 reference tightly.
    logits = emotion_classifier_forward(
        token_ids, emb_table, conv_w, conv_b, fc_w, fc_b
    )
    logits = jax.block_until_ready(logits)
    assert logits.shape == (B, C)
    assert jnp.allclose(logits, ref, atol=1e-4, rtol=1e-4), (logits, ref)

    # bf16 MXU-input path (v6e/v7x speed path); epilogue stays f32.
    logits_bf16 = emotion_classifier_forward(
        token_ids, emb_table, conv_w, conv_b, fc_w, fc_b,
        matmul_dtype=jnp.bfloat16,
    )
    logits_bf16 = jax.block_until_ready(logits_bf16)
    assert jnp.allclose(logits_bf16, ref, atol=3e-2, rtol=3e-2), (logits_bf16, ref)

    print("KERNEL_OK")
</pallas_src>

<mosaic_0001>
module attributes {stable_mosaic.version = 11 : i64} {
  func.func @kernel(%arg0: i32, %arg1: memref<2x8x32xf32, #tpu.memory_space<vmem>>, %arg2: memref<96x64xf32, #tpu.memory_space<vmem>>, %arg3: memref<1x64xf32, #tpu.memory_space<vmem>>, %arg4: memref<64x128xf32, #tpu.memory_space<vmem>>, %arg5: memref<1x128xf32, #tpu.memory_space<vmem>>, %arg6: memref<2x128xf32, #tpu.memory_space<vmem>>) attributes {dimension_semantics = [#tpu.dimension_semantics<parallel>], iteration_bounds = array<i64: 1>, scalar_prefetch = 0 : i64, scratch_operands = 0 : i64, tpu.core_type = #tpu.core_type<tc>, window_params = [{transform_indices = @transform_0, window_bounds = array<i64: 2, 8, 32>}, {pipeline_mode = #tpu.pipeline_mode<synchronous>, transform_indices = @transform_1, window_bounds = array<i64: 96, 64>}, {pipeline_mode = #tpu.pipeline_mode<synchronous>, transform_indices = @transform_2, window_bounds = array<i64: 1, 64>}, {pipeline_mode = #tpu.pipeline_mode<synchronous>, transform_indices = @transform_3, window_bounds = array<i64: 64, 128>}, {pipeline_mode = #tpu.pipeline_mode<synchronous>, transform_indices = @transform_4, window_bounds = array<i64: 1, 128>}, {transform_indices = @transform_5, window_bounds = array<i64: 2, 128>}]} {
    %c0 = arith.constant 0 : index
    %c0_0 = arith.constant 0 : index
    %c0_1 = arith.constant 0 : index
    %0 = vector.load %arg1[%c0, %c0_0, %c0_1] : memref<2x8x32xf32, #tpu.memory_space<vmem>>, vector<2x8x32xf32>
    %cst = arith.constant 0.000000e+00 : f32
    %1 = vector.broadcast %cst : f32 to vector<2x1x32xf32>
    %2 = vector.extract_strided_slice %0 {offsets = [0, 0, 0], sizes = [2, 7, 32], strides = [1, 1, 1]} : vector<2x8x32xf32> to vector<2x7x32xf32>
    %3 = tpu.concatenate %1, %2 in 1 : vector<2x1x32xf32>, vector<2x7x32xf32> -> vector<2x8x32xf32>
    %4 = vector.extract_strided_slice %0 {offsets = [0, 1, 0], sizes = [2, 7, 32], strides = [1, 1, 1]} : vector<2x8x32xf32> to vector<2x7x32xf32>
    %5 = tpu.concatenate %4, %1 in 1 : vector<2x7x32xf32>, vector<2x1x32xf32> -> vector<2x8x32xf32>
    %6 = tpu.concatenate %3, %0, %5 in 2 : vector<2x8x32xf32>, vector<2x8x32xf32>, vector<2x8x32xf32> -> vector<2x8x96xf32>
    %7 = vector.shape_cast %6 : vector<2x8x96xf32> to vector<16x96xf32>
    %c0_2 = arith.constant 0 : index
    %c0_3 = arith.constant 0 : index
    %8 = vector.load %arg2[%c0_2, %c0_3] : memref<96x64xf32, #tpu.memory_space<vmem>>, vector<96x64xf32>
    %cst_4 = arith.constant dense<0.000000e+00> : vector<16x64xf32>
    %9 = tpu.matmul %7, %8, %cst_4 {dimension_numbers = #tpu.dot_dimension_numbers<[1], [0], [0], [1], [0, 0, 1, 1], [], []>} : vector<16x96xf32>, vector<96x64xf32>, vector<16x64xf32> -> vector<16x64xf32>
    %c0_5 = arith.constant 0 : index
    %c0_6 = arith.constant 0 : index
    %10 = vector.load %arg3[%c0_5, %c0_6] : memref<1x64xf32, #tpu.memory_space<vmem>>, vector<1x64xf32>
    %11 = vector.broadcast %10 : vector<1x64xf32> to vector<16x64xf32>
    %12 = arith.addf %9, %11 : vector<16x64xf32>
    %cst_7 = arith.constant 0.000000e+00 : f32
    %13 = vector.broadcast %cst_7 : f32 to vector<16x64xf32>
    %14 = arith.maximumf %12, %13 : vector<16x64xf32>
    %15 = vector.shape_cast %14 : vector<16x64xf32> to vector<2x8x64xf32>
    %cst_8 = arith.constant dense<0.000000e+00> : vector<2x64xf32>
    %16 = vector.multi_reduction <add>, %15, %cst_8 [1] : vector<2x8x64xf32> to vector<2x64xf32>
    %cst_9 = arith.constant 1.250000e-01 : f32
    %17 = vector.broadcast %cst_9 : f32 to vector<2x64xf32>
    %18 = arith.mulf %16, %17 : vector<2x64xf32>
    %c0_10 = arith.constant 0 : index
    %c0_11 = arith.constant 0 : index
    %19 = vector.load %arg4[%c0_10, %c0_11] : memref<64x128xf32, #tpu.memory_space<vmem>>, vector<64x128xf32>
    %cst_12 = arith.constant dense<0.000000e+00> : vector<2x128xf32>
    %20 = tpu.matmul %18, %19, %cst_12 {dimension_numbers = #tpu.dot_dimension_numbers<[1], [0], [0], [1], [0, 0, 1, 1], [], []>} : vector<2x64xf32>, vector<64x128xf32>, vector<2x128xf32> -> vector<2x128xf32>
    %c0_13 = arith.constant 0 : index
    %c0_14 = arith.constant 0 : index
    %21 = vector.load %arg5[%c0_13, %c0_14] : memref<1x128xf32, #tpu.memory_space<vmem>>, vector<1x128xf32>
    %22 = vector.broadcast %21 : vector<1x128xf32> to vector<2x128xf32>
    %23 = arith.addf %20, %22 : vector<2x128xf32>
    %c0_15 = arith.constant 0 : index
    %c0_16 = arith.constant 0 : index
    %24 = vector.load %arg6[%c0_15, %c0_16] : memref<2x128xf32, #tpu.memory_space<vmem>>, vector<2x128xf32>
    tpu.vector_store %arg6[%c0_15, %c0_16], %23 {strides = array<i32>} : memref<2x128xf32, #tpu.memory_space<vmem>>, vector<2x128xf32>,
    return
  }
  func.func @transform_0(%arg0: i32) -> (i32, i32, i32) {
    %c0_i32 = arith.constant 0 : i32
    %c0_i32_0 = arith.constant 0 : i32
    %c0_i32_1 = arith.constant 0 : i32
    return %arg0, %c0_i32, %c0_i32_0 : i32, i32, i32
  }
  func.func @transform_1(%arg0: i32) -> (i32, i32) {
    %c0_i32 = arith.constant 0 : i32
    %c0_i32_0 = arith.constant 0 : i32
    %c0_i32_1 = arith.constant 0 : i32
    return %c0_i32, %c0_i32_0 : i32, i32
  }
  func.func @transform_2(%arg0: i32) -> (i32, i32) {
    %c0_i32 = arith.constant 0 : i32
    %c0_i32_0 = arith.constant 0 : i32
    %c0_i32_1 = arith.constant 0 : i32
    return %c0_i32, %c0_i32_0 : i32, i32
  }
  func.func @transform_3(%arg0: i32) -> (i32, i32) {
    %c0_i32 = arith.constant 0 : i32
    %c0_i32_0 = arith.constant 0 : i32
    %c0_i32_1 = arith.constant 0 : i32
    return %c0_i32, %c0_i32_0 : i32, i32
  }
  func.func @transform_4(%arg0: i32) -> (i32, i32) {
    %c0_i32 = arith.constant 0 : i32
    %c0_i32_0 = arith.constant 0 : i32
    %c0_i32_1 = arith.constant 0 : i32
    return %c0_i32, %c0_i32_0 : i32, i32
  }
  func.func @transform_5(%arg0: i32) -> (i32, i32) {
    %c0_i32 = arith.constant 0 : i32
    %c0_i32_0 = arith.constant 0 : i32
    return %arg0, %c0_i32 : i32, i32
  }
}

</mosaic_0001>

<bundles_post_ra>
// kernel: tpu_custom_call.1
= control target key start
LH: loop header
LB: loop body
LE: loop exit
PB: predicated region body
PF: predicated region fallthrough
CT: control target
= control target key end

     0   :  { %vm36_vm0 = vcmask 1046528   ;;  %s385_s24 = smov 32   ;;  %s502_s0 = inlined_call_operand.vmem [shape: f32[2,8,32], index: 0, kind: input, shape index: {}]   ;;  %s503_s1 = inlined_call_operand.vmem [shape: f32[96,64], index: 1, kind: input, shape index: {}]   ;;  %s504_s2 = inlined_call_operand.vmem [shape: f32[1,64], index: 2, kind: input, shape index: {}]   ;;  %s505_s3 = inlined_call_operand.vmem [shape: f32[64,128], index: 3, kind: input, shape index: {}]   ;;  %s506_s4 = inlined_call_operand.vmem [shape: f32[1,128], index: 4, kind: input, shape index: {}]   ;;  %s507_s5 = inlined_call_operand.hbm [shape: f32[2,128], index: 5, kind: output, shape index: {}]  }
   0x1   :  { %v21_v0 = vld [vmem:[%s502_s0] sm:$0xff]  ;;  %v22_v1 = vld [vmem:[%s502_s0 + $0x8] sm:$0xff]  ;;  %v70_v2 = vld [vmem:[%s503_s1 + $0x58] sm:$0xff]  ;;  %s386_s0 = smov 64  }
   0x2   :  { %39 = vrot.lane.b32.xlu0 %v21_v0, %s385_s24  ;;  %v32_v3 = vrot.slane %v21_v0, 1  ;;  %v33_v4 = vrot.slane %v22_v1, 1  ;;  %312 = vmatprep.subr.mxu0 %v70_v2  ;;  %v69_v5 = vld [vmem:[%s503_s1 + $0x50] sm:$0xff]  ;;  %v68_v6 = vld [vmem:[%s503_s1 + $0x48] sm:$0xff]  ;;  %v67_v8 = vld [vmem:[%s503_s1 + $0x40] sm:$0xff] }
   0x3   :  { %313 = vmatpush3.msra.mxu0 %v70_v2 }
   0x4   :  { %v37_v7 = vsel %vm36_vm0, %v32_v3, 0.0  ;;  %314 = vmatprep.subr.mxu0 %v69_v5  ;;  %v38_v9 = vsel %vm36_vm0, %v33_v4, 0.0 }
   0x5   :  { %47 = vrot.lane.b32.xlu1 %v37_v7, %s386_s0  ;;  %315 = vmatpush3.msra.mxu0 %v69_v5 }
   0x6   :  { %41 = vrot.lane.b32.xlu0 %v22_v1, %s385_s24  ;;  %316 = vmatprep.subr.mxu0 %v68_v6 }
   0x7   :  { %10 = vsyncpa [#allocation3], 0  ;;  %317 = vmatpush3.msra.mxu0 %v68_v6  ;;  %v66_v10 = vld [vmem:[%s503_s1 + $0x38] sm:$0xff]  ;;  %v65_v11 = vld [vmem:[%s503_s1 + $0x30] sm:$0xff]  ;;  %v25_v18 = vrot.slane %v21_v0, 7  ;;  %vm29_vm1 = vcmask 1040384  }
   0x8   :  { %318 = vmatprep.subr.mxu0 %v67_v8  ;;  %v64_v12 = vld [vmem:[%s503_s1 + $0x28] sm:$0xff]  ;;  %v63_v13 = vld [vmem:[%s503_s1 + $0x20] sm:$0xff]  ;;  %v62_v14 = vld [vmem:[%s503_s1 + $0x18] sm:$0xff]  ;;  %v26_v19 = vrot.slane %v22_v1, 7  ;;  %vm53_vm2 = vcmask 261120   ;;  %vm56_vm3 = vcmask 523264  }
   0x9   :  { %49 = vrot.lane.b32.xlu1 %v38_v9, %s386_s0  ;;  %319 = vmatpush3.msra.mxu0 %v67_v8  ;;  %v61_v15 = vld [vmem:[%s503_s1 + $0x10] sm:$0xff]  ;;  %v60_v16 = vld [vmem:[%s503_s1 + $0x8] sm:$0xff]  ;;  %v59_v17 = vld [vmem:[%s503_s1] sm:$0xff]  ;;  %v30_v20 = vsel %vm29_vm1, 0.0, %v25_v18  ;;  %vm78_vm4 = vcmask 785408   ;;  %v387_v30 = vmov 0.0  }
   0xa   :  { %320 = vmatprep.subr.mxu0 %v66_v10  ;;  %v31_v23 = vsel %vm29_vm1, 0.0, %v26_v19  ;;  %339 = vmatprep.subr.mxu1 %v387_v30  ;;  %v185_v31 = vld [vmem:[%s505_s3 + $0x38] sm:$0xff]  ;;  %v184_v32 = vld [vmem:[%s505_s3 + $0x30] sm:$0xff]  ;;  %v183_v33 = vld [vmem:[%s505_s3 + $0x28] sm:$0xff]  ;;  %vm388_vm5 = vmmov 0   ;;  %vm195_vm6 = vcmask 1041409  }
   0xb   :  { %321 = vmatpush3.msra.mxu0 %v66_v10  ;;  %340 = vmatpush3.msra.mxu1 %v185_v31  ;;  %v182_v34 = vld [vmem:[%s505_s3 + $0x20] sm:$0xff]  ;;  %v181_v35 = vld [vmem:[%s505_s3 + $0x18] sm:$0xff]  ;;  %v180_v36 = vld [vmem:[%s505_s3 + $0x10] sm:$0xff]  ;;  %s389_s13 = smov [#allocation2]  }
   0xc   :  { %322 = vmatprep.subr.mxu0 %v65_v11  ;;  %341 = vmatprep.subr.mxu1 %v387_v30  ;;  %v179_v37 = vld [vmem:[%s505_s3 + $0x8] sm:$0xff]  ;;  %v178_v38 = vld [vmem:[%s505_s3] sm:$0xff]  ;;  %s276_s14 = sshll.u32 %s389_s13, 4  ;;  %s277_s14 = int_to_ptr.vmem [resolvable:$true] %s276_s14 }
   0xd   :  { %323 = vmatpush3.msra.mxu0 %v65_v11  ;;  %342 = vmatpush3.msra.mxu1 %v184_v32  ;;  %v284_v39 = vld [vmem:[%s504_s2] ss:$0 sm:$0xff]  ;;  %s363_s15 = scalar_lea.vmem %s277_s14, 32  ;;  %p368_p1 = scmp.lt.s32.totalorder %s277_s14, %s277_s14 }
   0xe   :  { %324 = vmatprep.subr.mxu0 %v64_v12  ;;  %343 = vmatprep.subr.mxu1 %v387_v30  ;;  %v287_v63 = vld [vmem:[%s506_s4] ss:$0 sm:$0xff]  ;;  %p364_p0 = scmp.ne.s32.totalorder %s277_s14, %s363_s15  ;;  %p369_p2 = scmp.lt.s32.totalorder %s363_s15, %s363_s15 }
   0xf   :  { %325 = vmatpush3.msra.mxu0 %v64_v12  ;;  %344 = vmatpush3.msra.mxu1 %v183_v33 }
  0x10   :  { %326 = vmatprep.subr.mxu0 %v63_v13  ;;  %345 = vmatprep.subr.mxu1 %v387_v30  ;;  %p370_p3 = por %p369_p2, %p368_p1 }
  0x11   :  { %327 = vmatpush3.msra.mxu0 %v63_v13  ;;  %346 = vmatpush3.msra.mxu1 %v182_v34 }
  0x12   :  { %328 = vmatprep.subr.mxu0 %v62_v14  ;;  %347 = vmatprep.subr.mxu1 %v387_v30  ;;  %p371_p4 = pnand %p370_p3, %p364_p0 }
  0x13   :  { %329 = vmatpush3.msra.mxu0 %v62_v14  ;;  %348 = vmatpush3.msra.mxu1 %v181_v35 }
  0x14   :  { %330 = vmatprep.subr.mxu0 %v61_v15  ;;  %349 = vmatprep.subr.mxu1 %v387_v30 }
  0x15   :  { %331 = vmatpush3.msra.mxu0 %v61_v15  ;;  %350 = vmatpush3.msra.mxu1 %v180_v36 }
  0x16   :  { %332 = vmatprep.subr.mxu0 %v60_v16  ;;  %351 = vmatprep.subr.mxu1 %v387_v30 }
  0x17   :  { %333 = vmatpush3.msra.mxu0 %v60_v16  ;;  %355 = vmatprep.mubr.msk.f32.mxu1 %vm388_vm5, %v387_v30 }
  0x18   :  { %334 = vmatprep.subr.mxu0 %v59_v17  ;;  %352 = vmatpush3.msra.mxu1 %v179_v37 }
  0x19   :  { %335 = vmatpush3.msra.mxu0 %v59_v17  ;;  %353 = vmatprep.subr.mxu1 %v387_v30 }
  0x1a   :  { %354 = vmatpush3.msra.mxu1 %v178_v38 }
  0x74   :  { %v40_v21 = vpop.permute.xlu0 %39 }
  0x75   :  { %v54_v22 = vsel %vm53_vm2, %v30_v20, %v40_v21 }
  0x77   :  { %v48_v24 = vpop.permute.xlu1 %47 }
  0x78   :  { %v57_v25 = vsel %vm56_vm3, %v54_v22, %v48_v24  ;;  %v42_v26 = vpop.permute.xlu0 %41 }
  0x79   :  { %336 = vmatprep.mubr.msk.f32.mxu0 %vm78_vm4, %v57_v25  ;;  %v55_v27 = vsel %vm53_vm2, %v31_v23, %v42_v26 }
  0x7b   :  { %v50_v28 = vpop.permute.xlu1 %49 }
  0x7c   :  { %v58_v29 = vsel %vm56_vm3, %v55_v27, %v50_v28 }
  0x7d   :  { %337 = vmatmul.mubr.msk.f32.vlgmr.msra.gmra.mxu0 %vm78_vm4, %v58_v29 }
 0x13d   :  { %v338_v40 = vpop.f32.mrf.mxu0 }
 0x13e   :  { %v157_v41 = vadd.f32 %v338_v40, %v284_v39 }
 0x13f   :  { %v151_v42 = vpop.f32.mrf.mxu0 }
 0x140   :  { %v161_v43 = vmax.f32 %v157_v41, 0.0  ;;  %v152_v44 = vadd.f32 %v284_v39, %v151_v42 }
 0x142   :  { %v169_v45 = vsel %vm56_vm3, %v161_v43, 0.0  ;;  %v160_v46 = vmax.f32 %v152_v44, 0.0 }
 0x143   :  { %v170_v47 = vrot.slane %v169_v45, 4 }
 0x144   :  { %v162_v48 = vsel %vm56_vm3, %v160_v46, 0.0 }
 0x145   :  { %v171_v49 = vadd.f32 %v170_v47, %v169_v45  ;;  %v163_v50 = vrot.slane %v162_v48, 4 }
 0x147   :  { %v172_v51 = vrot.slane %v171_v49, 2  ;;  %v164_v52 = vadd.f32 %v163_v50, %v162_v48 }
 0x149   :  { %v173_v53 = vadd.f32 %v172_v51, %v171_v49  ;;  %v165_v54 = vrot.slane %v164_v52, 2 }
 0x14b   :  { %v174_v55 = vrot.slane %v173_v53, 1  ;;  %v166_v56 = vadd.f32 %v165_v54, %v164_v52 }
 0x14d   :  { %v175_v57 = vadd.f32 %v174_v55, %v173_v53  ;;  %v167_v58 = vrot.slane %v166_v56, 1 }
 0x14f   :  { %v168_v59 = vadd.f32 %v167_v58, %v166_v56  ;;  %v177_v61 = vmul.f32 0.125, %v175_v57 }
 0x151   :  { %v176_v60 = vmul.f32 0.125, %v168_v59 }
 0x153   :  { %v196_v62 = vsel %vm195_vm6, %v177_v61, %v176_v60 }
 0x154   :  { %356 = vmatmul.mubr.msk.f32.vlgmr.msra.gmra.mxu1 %vm56_vm3, %v196_v62 }
 0x214   :  { %v265_v0 = vpop.f32.mrf.mxu1 }
 0x215   :  { %v266_v1 = vadd.f32 %v287_v63, %v265_v0 }
 0x216   :  { %v357_v2 = vpop.f32.mrf.mxu1 }
 0x217   :  { %269 = vst [vmem:[#allocation2] sm:$0x3] %v266_v1 }
 0x218   :  { %374 = shalt.err (!%p371_p4)
}
 0x219   :  { %279 = dma.vmem_to_hbm [thread:$0]  %s277_s14, 32, %s507_s5, [#allocation3]  }
 0x21a   :  { %383 = dma.done.wait [#allocation3], 32  }
 0x21b   :  { %384 = vsyncadd [#allocation3], 4294967264 }
 0x21c   :  { %283 = vsyncpa [#allocation3], 1 }

</bundles_post_ra>
